<compile_context>
chip_gen: v7x
topology: tpu7x:2x2x1
jax: 0.10.0
libtpu: 0.0.40
codegen_flags: <defaults>
</compile_context>

<pallas_src>
import numpy as np

import jax
import jax.numpy as jnp
from jax.experimental import pallas as pl
from jax.experimental.pallas import tpu as pltpu

# ---------------- model hyper-params (small, consistent with the module) ----
BATCH = 8
VOCAB = 50          # vocabs_size == output_size
EMB = 32            # embedding_dimension
HIDDEN = 64         # hidden_size
N_LAYERS = 3

# ---------------- packed / padded sizes --------------------------------------
E_PAD = 64              # embedding padded 32 -> 64 so [x | h] packs into K=128
K_IN = E_PAD + HIDDEN   # 128 : fused gate-matmul contraction width
G4 = 4 * HIDDEN         # 256 : tight gate width, gates [i,f,g,o] each 64 lanes
V_PAD = 128             # logits padded 50 -> 128 for unmasked lane-dense store

_VMEM = pl.BlockSpec(memory_space=pltpu.MemorySpace.VMEM)
_SMEM = pl.BlockSpec(memory_space=pltpu.MemorySpace.SMEM)


# ---------------- fused Pallas kernel ----------------------------------------
def _fused_forward_kernel(tok_ref, h0_ref, c0_ref, emb_ref,
                          w_all_ref, b_all_ref, w_lin_ref, b_lin_ref,
                          logits_ref, hn_ref, cn_ref, x_scr):
    """tok: (B,) i32 in SMEM; h0/c0: (L,B,H) f32; emb: (V,E_PAD) f32;
    w_all: (L,K_IN,G4) bf16; b_all: (L,1,G4) f32; w_lin: (H,V_PAD) bf16;
    b_lin: (1,V_PAD) f32; x_scr: (B,E_PAD) f32 VMEM scratch."""
    batch = x_scr.shape[0]

    # Embedding lookup: B=8 dynamic row copies from the (f32, sublane-aligned)
    # table — off the MXU, essentially free on the load/store slots.
    for i in range(batch):                                        # static unroll
        x_scr[pl.ds(i, 1), :] = emb_ref[pl.ds(tok_ref[i], 1), :]  # (1, E_PAD)
    layer_in = x_scr[...].astype(jnp.bfloat16)                    # (B, E_PAD)

    for layer in range(N_LAYERS):                                 # static unroll
        h = h0_ref[layer]                                         # (B, H) f32
        c = c0_ref[layer]                                         # (B, H) f32
        # Single fused bf16 matmul: [x, h] @ [W_ih; W_hh] + (b_ih + b_hh).
        xh = jnp.concatenate([layer_in, h.astype(jnp.bfloat16)], axis=-1)  # (B,128)
        gates = (jnp.dot(xh, w_all_ref[layer],
                         preferred_element_type=jnp.float32)
                 + b_all_ref[layer])                              # (B, 256) f32
        i_g = jax.nn.sigmoid(gates[:, 0 * HIDDEN:1 * HIDDEN])     # f32 activations
        f_g = jax.nn.sigmoid(gates[:, 1 * HIDDEN:2 * HIDDEN])
        g_g = jnp.tanh(gates[:, 2 * HIDDEN:3 * HIDDEN])
        o_g = jax.nn.sigmoid(gates[:, 3 * HIDDEN:4 * HIDDEN])
        c_new = f_g * c + i_g * g_g                               # f32 state math
        h_new = o_g * jnp.tanh(c_new)
        hn_ref[layer] = h_new                                     # (B, 64)
        cn_ref[layer] = c_new
        layer_in = h_new.astype(jnp.bfloat16)

    # Output projection, 128-lane-dense store (cols >= VOCAB are exactly zero).
    logits_ref[...] = (jnp.dot(layer_in, w_lin_ref[...],
                               preferred_element_type=jnp.float32)
                       + b_lin_ref[...])                          # (B, V_PAD)


# ---------------- parameter init (deterministic, PyTorch-like) ---------------
def init_params(key):
    """Returns (packed params for the kernel, raw f32 params for the reference)."""
    params, raw = {}, {}

    k_emb, key = jax.random.split(key)
    emb = jax.random.normal(k_emb, (VOCAB, EMB), jnp.float32)
    raw["embedding"] = emb
    # f32 table (12.8 KB): keeps the dynamic row gather sublane-aligned and exact.
    params["emb_p"] = jnp.zeros((VOCAB, E_PAD), jnp.float32).at[:, :EMB].set(emb)

    bound = 1.0 / np.sqrt(HIDDEN)
    w_list, b_list = [], []
    for layer in range(N_LAYERS):
        d_in = EMB if layer == 0 else HIDDEN
        k1, k2, k3, k4, key = jax.random.split(key, 5)
        w_ih = jax.random.uniform(k1, (4 * HIDDEN, d_in), jnp.float32, -bound, bound)
        w_hh = jax.random.uniform(k2, (4 * HIDDEN, HIDDEN), jnp.float32, -bound, bound)
        b_ih = jax.random.uniform(k3, (4 * HIDDEN,), jnp.float32, -bound, bound)
        b_hh = jax.random.uniform(k4, (4 * HIDDEN,), jnp.float32, -bound, bound)
        raw[f"w_ih_t_{layer}"] = w_ih.T                 # (d_in, 4H)
        raw[f"w_hh_t_{layer}"] = w_hh.T                 # (H, 4H)
        raw[f"b_{layer}"] = (b_ih + b_hh)[None, :]      # (1, 4H)

        # Packed weight: rows [0:d_in) take x, rows [E_PAD:E_PAD+H) take h.
        # Gate columns are the raw, tightly packed [i|f|g|o] (64 each).
        w_cat = jnp.zeros((K_IN, G4), jnp.float32)
        w_cat = w_cat.at[:d_in, :].set(w_ih.T)
        w_cat = w_cat.at[E_PAD:E_PAD + HIDDEN, :].set(w_hh.T)
        w_list.append(w_cat)
        b_list.append((b_ih + b_hh)[None, :])
    params["w_all_p"] = jnp.stack(w_list).astype(jnp.bfloat16)    # (L, 128, 256) bf16
    params["b_all_p"] = jnp.stack(b_list)                         # (L, 1, 256) f32

    k5, k6, key = jax.random.split(key, 3)
    w_lin = jax.random.uniform(k5, (VOCAB, HIDDEN), jnp.float32, -bound, bound)
    b_lin = jax.random.uniform(k6, (VOCAB,), jnp.float32, -bound, bound)
    raw["w_lin_t"] = w_lin.T
    raw["b_lin"] = b_lin[None, :]
    params["w_lin_p"] = (jnp.zeros((HIDDEN, V_PAD), jnp.float32)
                         .at[:, :VOCAB].set(w_lin.T).astype(jnp.bfloat16))
    params["b_lin_p"] = jnp.zeros((1, V_PAD), jnp.float32).at[0, :VOCAB].set(b_lin)
    return params, raw


# ---------------- forward pass (mirrors generative_model.forward) ------------
@jax.jit
def generative_model_forward(params, tokens, hidden):
    """tokens: (B,) int32 (must be < VOCAB); hidden = (h0, c0), each
    (n_layers, B, HIDDEN).  Returns (logits (B, VOCAB), (h_n, c_n)) — a single
    time step, like the module."""
    h0, c0 = hidden
    b = tokens.shape[0]

    logits_p, h_n, c_n = pl.pallas_call(
        _fused_forward_kernel,
        out_shape=(jax.ShapeDtypeStruct((b, V_PAD), jnp.float32),
                   jax.ShapeDtypeStruct((N_LAYERS, b, HIDDEN), jnp.float32),
                   jax.ShapeDtypeStruct((N_LAYERS, b, HIDDEN), jnp.float32)),
        in_specs=[_SMEM, _VMEM, _VMEM, _VMEM, _VMEM, _VMEM, _VMEM, _VMEM],
        out_specs=(_VMEM, _VMEM, _VMEM),
        scratch_shapes=[pltpu.VMEM((b, E_PAD), jnp.float32)],
        # Recurrent state is updated in place (h0 -> h_n, c0 -> c_n).
        input_output_aliases={1: 1, 2: 2},
    )(tokens.astype(jnp.int32), h0, c0, params["emb_p"],
      params["w_all_p"], params["b_all_p"], params["w_lin_p"], params["b_lin_p"])

    return logits_p[:, :VOCAB], (h_n, c_n)


def init_hidden(batch_size):
    return (jnp.zeros((N_LAYERS, batch_size, HIDDEN), jnp.float32),
            jnp.zeros((N_LAYERS, batch_size, HIDDEN), jnp.float32))


# ---------------- pure-JAX reference (module semantics, full f32) ------------
def reference_forward(raw, tokens, hidden):
    h0, c0 = hidden
    hp = jax.lax.Precision.HIGHEST
    x = raw["embedding"][tokens]                           # (B, E)
    h_list, c_list = [], []
    inp = x
    for layer in range(N_LAYERS):
        gates = (jnp.dot(inp, raw[f"w_ih_t_{layer}"], precision=hp)
                 + jnp.dot(h0[layer], raw[f"w_hh_t_{layer}"], precision=hp)
                 + raw[f"b_{layer}"])
        i = jax.nn.sigmoid(gates[:, 0 * HIDDEN:1 * HIDDEN])
        f = jax.nn.sigmoid(gates[:, 1 * HIDDEN:2 * HIDDEN])
        g = jnp.tanh(gates[:, 2 * HIDDEN:3 * HIDDEN])
        o = jax.nn.sigmoid(gates[:, 3 * HIDDEN:4 * HIDDEN])
        c_new = f * c0[layer] + i * g
        h_new = o * jnp.tanh(c_new)
        h_list.append(h_new)
        c_list.append(c_new)
        inp = h_new
    logits = jnp.dot(inp, raw["w_lin_t"], precision=hp) + raw["b_lin"]
    return logits, (jnp.stack(h_list), jnp.stack(c_list))


if __name__ == "__main__":
    key = jax.random.PRNGKey(0)
    k_tok, k_h, k_c, k_params = jax.random.split(key, 4)
    params, raw = init_params(k_params)
    tokens = jax.random.randint(k_tok, (BATCH,), 0, VOCAB, dtype=jnp.int32)
    # Random hidden state exercises both recurrent paths (init_hidden() also works).
    hidden = (0.1 * jax.random.normal(k_h, (N_LAYERS, BATCH, HIDDEN), jnp.float32),
              0.1 * jax.random.normal(k_c, (N_LAYERS, BATCH, HIDDEN), jnp.float32))

    logits, (h_n, c_n) = generative_model_forward(params, tokens, hidden)
    jax.block_until_ready((logits, h_n, c_n))

    assert logits.shape == (BATCH, VOCAB)
    assert h_n.shape == (N_LAYERS, BATCH, HIDDEN)
    assert c_n.shape == (N_LAYERS, BATCH, HIDDEN)

    ref_logits, (ref_h, ref_c) = reference_forward(raw, tokens, hidden)
    # Tolerances loosened vs. the f32 reference to cover bf16 weight/operand
    # quantization in the kernel (review: re-validate after the bf16 change).
    np.testing.assert_allclose(np.asarray(logits), np.asarray(ref_logits),
                               rtol=2e-2, atol=2e-2)
    np.testing.assert_allclose(np.asarray(h_n), np.asarray(ref_h),
                               rtol=2e-2, atol=2e-2)
    np.testing.assert_allclose(np.asarray(c_n), np.asarray(ref_c),
                               rtol=2e-2, atol=2e-2)
    print("KERNEL_OK")
</pallas_src>

<mosaic_0001>
module attributes {stable_mosaic.version = 11 : i64} {
  func.func @_fused_forward_kernel(%arg0: memref<8xi32, #tpu.memory_space<smem>>, %arg1: memref<3x8x64xf32, #tpu.memory_space<vmem>>, %arg2: memref<3x8x64xf32, #tpu.memory_space<vmem>>, %arg3: memref<50x64xf32, #tpu.memory_space<vmem>>, %arg4: memref<3x128x256xbf16, #tpu.memory_space<vmem>>, %arg5: memref<3x1x256xf32, #tpu.memory_space<vmem>>, %arg6: memref<64x128xbf16, #tpu.memory_space<vmem>>, %arg7: memref<1x128xf32, #tpu.memory_space<vmem>>, %arg8: memref<8x128xf32, #tpu.memory_space<vmem>>, %arg9: memref<3x8x64xf32, #tpu.memory_space<vmem>>, %arg10: memref<3x8x64xf32, #tpu.memory_space<vmem>>, %arg11: memref<8x64xf32, #tpu.memory_space<vmem>>) attributes {dimension_semantics = [], scalar_prefetch = 0 : i64, scratch_operands = 1 : i64, tpu.core_type = #tpu.core_type<tc>} {
    %c0 = arith.constant 0 : index
    %0 = memref.load %arg0[%c0] : memref<8xi32, #tpu.memory_space<smem>>
    %1 = arith.index_cast %0 : i32 to index
    %c0_0 = arith.constant 0 : index
    %2 = vector.load %arg3[%1, %c0_0] : memref<50x64xf32, #tpu.memory_space<vmem>>, vector<1x64xf32>
    %c0_1 = arith.constant 0 : index
    %c0_2 = arith.constant 0 : index
    %3 = vector.load %arg11[%c0_1, %c0_2] : memref<8x64xf32, #tpu.memory_space<vmem>>, vector<1x64xf32>
    tpu.vector_store %arg11[%c0_1, %c0_2], %2 {strides = array<i32>} : memref<8x64xf32, #tpu.memory_space<vmem>>, vector<1x64xf32>,
    %c1 = arith.constant 1 : index
    %4 = memref.load %arg0[%c1] : memref<8xi32, #tpu.memory_space<smem>>
    %5 = arith.index_cast %4 : i32 to index
    %c0_3 = arith.constant 0 : index
    %6 = vector.load %arg3[%5, %c0_3] : memref<50x64xf32, #tpu.memory_space<vmem>>, vector<1x64xf32>
    %c1_4 = arith.constant 1 : index
    %c0_5 = arith.constant 0 : index
    %7 = vector.load %arg11[%c1_4, %c0_5] : memref<8x64xf32, #tpu.memory_space<vmem>>, vector<1x64xf32>
    tpu.vector_store %arg11[%c1_4, %c0_5], %6 {strides = array<i32>} : memref<8x64xf32, #tpu.memory_space<vmem>>, vector<1x64xf32>,
    %c2 = arith.constant 2 : index
    %8 = memref.load %arg0[%c2] : memref<8xi32, #tpu.memory_space<smem>>
    %9 = arith.index_cast %8 : i32 to index
    %c0_6 = arith.constant 0 : index
    %10 = vector.load %arg3[%9, %c0_6] : memref<50x64xf32, #tpu.memory_space<vmem>>, vector<1x64xf32>
    %c2_7 = arith.constant 2 : index
    %c0_8 = arith.constant 0 : index
    %11 = vector.load %arg11[%c2_7, %c0_8] : memref<8x64xf32, #tpu.memory_space<vmem>>, vector<1x64xf32>
    tpu.vector_store %arg11[%c2_7, %c0_8], %10 {strides = array<i32>} : memref<8x64xf32, #tpu.memory_space<vmem>>, vector<1x64xf32>,
    %c3 = arith.constant 3 : index
    %12 = memref.load %arg0[%c3] : memref<8xi32, #tpu.memory_space<smem>>
    %13 = arith.index_cast %12 : i32 to index
    %c0_9 = arith.constant 0 : index
    %14 = vector.load %arg3[%13, %c0_9] : memref<50x64xf32, #tpu.memory_space<vmem>>, vector<1x64xf32>
    %c3_10 = arith.constant 3 : index
    %c0_11 = arith.constant 0 : index
    %15 = vector.load %arg11[%c3_10, %c0_11] : memref<8x64xf32, #tpu.memory_space<vmem>>, vector<1x64xf32>
    tpu.vector_store %arg11[%c3_10, %c0_11], %14 {strides = array<i32>} : memref<8x64xf32, #tpu.memory_space<vmem>>, vector<1x64xf32>,
    %c4 = arith.constant 4 : index
    %16 = memref.load %arg0[%c4] : memref<8xi32, #tpu.memory_space<smem>>
    %17 = arith.index_cast %16 : i32 to index
    %c0_12 = arith.constant 0 : index
    %18 = vector.load %arg3[%17, %c0_12] : memref<50x64xf32, #tpu.memory_space<vmem>>, vector<1x64xf32>
    %c4_13 = arith.constant 4 : index
    %c0_14 = arith.constant 0 : index
    %19 = vector.load %arg11[%c4_13, %c0_14] : memref<8x64xf32, #tpu.memory_space<vmem>>, vector<1x64xf32>
    tpu.vector_store %arg11[%c4_13, %c0_14], %18 {strides = array<i32>} : memref<8x64xf32, #tpu.memory_space<vmem>>, vector<1x64xf32>,
    %c5 = arith.constant 5 : index
    %20 = memref.load %arg0[%c5] : memref<8xi32, #tpu.memory_space<smem>>
    %21 = arith.index_cast %20 : i32 to index
    %c0_15 = arith.constant 0 : index
    %22 = vector.load %arg3[%21, %c0_15] : memref<50x64xf32, #tpu.memory_space<vmem>>, vector<1x64xf32>
    %c5_16 = arith.constant 5 : index
    %c0_17 = arith.constant 0 : index
    %23 = vector.load %arg11[%c5_16, %c0_17] : memref<8x64xf32, #tpu.memory_space<vmem>>, vector<1x64xf32>
    tpu.vector_store %arg11[%c5_16, %c0_17], %22 {strides = array<i32>} : memref<8x64xf32, #tpu.memory_space<vmem>>, vector<1x64xf32>,
    %c6 = arith.constant 6 : index
    %24 = memref.load %arg0[%c6] : memref<8xi32, #tpu.memory_space<smem>>
    %25 = arith.index_cast %24 : i32 to index
    %c0_18 = arith.constant 0 : index
    %26 = vector.load %arg3[%25, %c0_18] : memref<50x64xf32, #tpu.memory_space<vmem>>, vector<1x64xf32>
    %c6_19 = arith.constant 6 : index
    %c0_20 = arith.constant 0 : index
    %27 = vector.load %arg11[%c6_19, %c0_20] : memref<8x64xf32, #tpu.memory_space<vmem>>, vector<1x64xf32>
    tpu.vector_store %arg11[%c6_19, %c0_20], %26 {strides = array<i32>} : memref<8x64xf32, #tpu.memory_space<vmem>>, vector<1x64xf32>,
    %c7 = arith.constant 7 : index
    %28 = memref.load %arg0[%c7] : memref<8xi32, #tpu.memory_space<smem>>
    %29 = arith.index_cast %28 : i32 to index
    %c0_21 = arith.constant 0 : index
    %30 = vector.load %arg3[%29, %c0_21] : memref<50x64xf32, #tpu.memory_space<vmem>>, vector<1x64xf32>
    %c7_22 = arith.constant 7 : index
    %c0_23 = arith.constant 0 : index
    %31 = vector.load %arg11[%c7_22, %c0_23] : memref<8x64xf32, #tpu.memory_space<vmem>>, vector<1x64xf32>
    tpu.vector_store %arg11[%c7_22, %c0_23], %30 {strides = array<i32>} : memref<8x64xf32, #tpu.memory_space<vmem>>, vector<1x64xf32>,
    %c0_24 = arith.constant 0 : index
    %c0_25 = arith.constant 0 : index
    %32 = vector.load %arg11[%c0_24, %c0_25] : memref<8x64xf32, #tpu.memory_space<vmem>>, vector<8x64xf32>
    %33 = arith.truncf %32 : vector<8x64xf32> to vector<8x64xbf16>
    %c0_26 = arith.constant 0 : index
    %c0_27 = arith.constant 0 : index
    %c0_28 = arith.constant 0 : index
    %34 = vector.load %arg1[%c0_26, %c0_27, %c0_28] : memref<3x8x64xf32, #tpu.memory_space<vmem>>, vector<1x8x64xf32>
    %35 = vector.shape_cast %34 : vector<1x8x64xf32> to vector<8x64xf32>
    %c0_29 = arith.constant 0 : index
    %c0_30 = arith.constant 0 : index
    %c0_31 = arith.constant 0 : index
    %36 = vector.load %arg2[%c0_29, %c0_30, %c0_31] : memref<3x8x64xf32, #tpu.memory_space<vmem>>, vector<1x8x64xf32>
    %37 = vector.shape_cast %36 : vector<1x8x64xf32> to vector<8x64xf32>
    %38 = arith.truncf %35 : vector<8x64xf32> to vector<8x64xbf16>
    %39 = tpu.concatenate %33, %38 in 1 : vector<8x64xbf16>, vector<8x64xbf16> -> vector<8x128xbf16>
    %c0_32 = arith.constant 0 : index
    %c0_33 = arith.constant 0 : index
    %c0_34 = arith.constant 0 : index
    %40 = vector.load %arg4[%c0_32, %c0_33, %c0_34] : memref<3x128x256xbf16, #tpu.memory_space<vmem>>, vector<1x128x256xbf16>
    %41 = vector.shape_cast %40 : vector<1x128x256xbf16> to vector<128x256xbf16>
    %cst = arith.constant dense<0.000000e+00> : vector<8x256xf32>
    %42 = tpu.matmul %39, %41, %cst {dimension_numbers = #tpu.dot_dimension_numbers<[1], [0], [0], [1], [0, 0, 1, 1], [], []>} : vector<8x128xbf16>, vector<128x256xbf16>, vector<8x256xf32> -> vector<8x256xf32>
    %c0_35 = arith.constant 0 : index
    %c0_36 = arith.constant 0 : index
    %c0_37 = arith.constant 0 : index
    %43 = vector.load %arg5[%c0_35, %c0_36, %c0_37] : memref<3x1x256xf32, #tpu.memory_space<vmem>>, vector<1x1x256xf32>
    %44 = vector.shape_cast %43 : vector<1x1x256xf32> to vector<1x256xf32>
    %45 = vector.broadcast %44 : vector<1x256xf32> to vector<8x256xf32>
    %46 = arith.addf %42, %45 : vector<8x256xf32>
    %47 = vector.extract_strided_slice %46 {offsets = [0, 0], sizes = [8, 64], strides = [1, 1]} : vector<8x256xf32> to vector<8x64xf32>
    %48 = arith.negf %47 : vector<8x64xf32>
    %49 = math.exp %48 : vector<8x64xf32>
    %cst_38 = arith.constant 1.000000e+00 : f32
    %50 = vector.broadcast %cst_38 : f32 to vector<8x64xf32>
    %51 = arith.addf %50, %49 : vector<8x64xf32>
    %52 = arith.divf %50, %51 : vector<8x64xf32>
    %53 = vector.extract_strided_slice %46 {offsets = [0, 64], sizes = [8, 64], strides = [1, 1]} : vector<8x256xf32> to vector<8x64xf32>
    %54 = arith.negf %53 : vector<8x64xf32>
    %55 = math.exp %54 : vector<8x64xf32>
    %cst_39 = arith.constant 1.000000e+00 : f32
    %56 = vector.broadcast %cst_39 : f32 to vector<8x64xf32>
    %57 = arith.addf %56, %55 : vector<8x64xf32>
    %58 = arith.divf %56, %57 : vector<8x64xf32>
    %59 = vector.extract_strided_slice %46 {offsets = [0, 128], sizes = [8, 64], strides = [1, 1]} : vector<8x256xf32> to vector<8x64xf32>
    %60 = math.tanh %59 : vector<8x64xf32>
    %61 = vector.extract_strided_slice %46 {offsets = [0, 192], sizes = [8, 64], strides = [1, 1]} : vector<8x256xf32> to vector<8x64xf32>
    %62 = arith.negf %61 : vector<8x64xf32>
    %63 = math.exp %62 : vector<8x64xf32>
    %cst_40 = arith.constant 1.000000e+00 : f32
    %64 = vector.broadcast %cst_40 : f32 to vector<8x64xf32>
    %65 = arith.addf %64, %63 : vector<8x64xf32>
    %66 = arith.divf %64, %65 : vector<8x64xf32>
    %67 = arith.mulf %58, %37 : vector<8x64xf32>
    %68 = arith.mulf %52, %60 : vector<8x64xf32>
    %69 = arith.addf %67, %68 : vector<8x64xf32>
    %70 = math.tanh %69 : vector<8x64xf32>
    %71 = arith.mulf %66, %70 : vector<8x64xf32>
    %c0_41 = arith.constant 0 : index
    %c0_42 = arith.constant 0 : index
    %c0_43 = arith.constant 0 : index
    %72 = vector.load %arg9[%c0_41, %c0_42, %c0_43] : memref<3x8x64xf32, #tpu.memory_space<vmem>>, vector<1x8x64xf32>
    %73 = vector.shape_cast %72 : vector<1x8x64xf32> to vector<8x64xf32>
    %74 = vector.shape_cast %71 : vector<8x64xf32> to vector<1x8x64xf32>
    tpu.vector_store %arg9[%c0_41, %c0_42, %c0_43], %74 {strides = array<i32>} : memref<3x8x64xf32, #tpu.memory_space<vmem>>, vector<1x8x64xf32>,
    %c0_44 = arith.constant 0 : index
    %c0_45 = arith.constant 0 : index
    %c0_46 = arith.constant 0 : index
    %75 = vector.load %arg10[%c0_44, %c0_45, %c0_46] : memref<3x8x64xf32, #tpu.memory_space<vmem>>, vector<1x8x64xf32>
    %76 = vector.shape_cast %75 : vector<1x8x64xf32> to vector<8x64xf32>
    %77 = vector.shape_cast %69 : vector<8x64xf32> to vector<1x8x64xf32>
    tpu.vector_store %arg10[%c0_44, %c0_45, %c0_46], %77 {strides = array<i32>} : memref<3x8x64xf32, #tpu.memory_space<vmem>>, vector<1x8x64xf32>,
    %78 = arith.truncf %71 : vector<8x64xf32> to vector<8x64xbf16>
    %c1_47 = arith.constant 1 : index
    %c0_48 = arith.constant 0 : index
    %c0_49 = arith.constant 0 : index
    %79 = vector.load %arg1[%c1_47, %c0_48, %c0_49] : memref<3x8x64xf32, #tpu.memory_space<vmem>>, vector<1x8x64xf32>
    %80 = vector.shape_cast %79 : vector<1x8x64xf32> to vector<8x64xf32>
    %c1_50 = arith.constant 1 : index
    %c0_51 = arith.constant 0 : index
    %c0_52 = arith.constant 0 : index
    %81 = vector.load %arg2[%c1_50, %c0_51, %c0_52] : memref<3x8x64xf32, #tpu.memory_space<vmem>>, vector<1x8x64xf32>
    %82 = vector.shape_cast %81 : vector<1x8x64xf32> to vector<8x64xf32>
    %83 = arith.truncf %80 : vector<8x64xf32> to vector<8x64xbf16>
    %84 = tpu.concatenate %78, %83 in 1 : vector<8x64xbf16>, vector<8x64xbf16> -> vector<8x128xbf16>
    %c1_53 = arith.constant 1 : index
    %c0_54 = arith.constant 0 : index
    %c0_55 = arith.constant 0 : index
    %85 = vector.load %arg4[%c1_53, %c0_54, %c0_55] : memref<3x128x256xbf16, #tpu.memory_space<vmem>>, vector<1x128x256xbf16>
    %86 = vector.shape_cast %85 : vector<1x128x256xbf16> to vector<128x256xbf16>
    %cst_56 = arith.constant dense<0.000000e+00> : vector<8x256xf32>
    %87 = tpu.matmul %84, %86, %cst_56 {dimension_numbers = #tpu.dot_dimension_numbers<[1], [0], [0], [1], [0, 0, 1, 1], [], []>} : vector<8x128xbf16>, vector<128x256xbf16>, vector<8x256xf32> -> vector<8x256xf32>
    %c1_57 = arith.constant 1 : index
    %c0_58 = arith.constant 0 : index
    %c0_59 = arith.constant 0 : index
    %88 = vector.load %arg5[%c1_57, %c0_58, %c0_59] : memref<3x1x256xf32, #tpu.memory_space<vmem>>, vector<1x1x256xf32>
    %89 = vector.shape_cast %88 : vector<1x1x256xf32> to vector<1x256xf32>
    %90 = vector.broadcast %89 : vector<1x256xf32> to vector<8x256xf32>
    %91 = arith.addf %87, %90 : vector<8x256xf32>
    %92 = vector.extract_strided_slice %91 {offsets = [0, 0], sizes = [8, 64], strides = [1, 1]} : vector<8x256xf32> to vector<8x64xf32>
    %93 = arith.negf %92 : vector<8x64xf32>
    %94 = math.exp %93 : vector<8x64xf32>
    %cst_60 = arith.constant 1.000000e+00 : f32
    %95 = vector.broadcast %cst_60 : f32 to vector<8x64xf32>
    %96 = arith.addf %95, %94 : vector<8x64xf32>
    %97 = arith.divf %95, %96 : vector<8x64xf32>
    %98 = vector.extract_strided_slice %91 {offsets = [0, 64], sizes = [8, 64], strides = [1, 1]} : vector<8x256xf32> to vector<8x64xf32>
    %99 = arith.negf %98 : vector<8x64xf32>
    %100 = math.exp %99 : vector<8x64xf32>
    %cst_61 = arith.constant 1.000000e+00 : f32
    %101 = vector.broadcast %cst_61 : f32 to vector<8x64xf32>
    %102 = arith.addf %101, %100 : vector<8x64xf32>
    %103 = arith.divf %101, %102 : vector<8x64xf32>
    %104 = vector.extract_strided_slice %91 {offsets = [0, 128], sizes = [8, 64], strides = [1, 1]} : vector<8x256xf32> to vector<8x64xf32>
    %105 = math.tanh %104 : vector<8x64xf32>
    %106 = vector.extract_strided_slice %91 {offsets = [0, 192], sizes = [8, 64], strides = [1, 1]} : vector<8x256xf32> to vector<8x64xf32>
    %107 = arith.negf %106 : vector<8x64xf32>
    %108 = math.exp %107 : vector<8x64xf32>
    %cst_62 = arith.constant 1.000000e+00 : f32
    %109 = vector.broadcast %cst_62 : f32 to vector<8x64xf32>
    %110 = arith.addf %109, %108 : vector<8x64xf32>
    %111 = arith.divf %109, %110 : vector<8x64xf32>
    %112 = arith.mulf %103, %82 : vector<8x64xf32>
    %113 = arith.mulf %97, %105 : vector<8x64xf32>
    %114 = arith.addf %112, %113 : vector<8x64xf32>
    %115 = math.tanh %114 : vector<8x64xf32>
    %116 = arith.mulf %111, %115 : vector<8x64xf32>
    %c1_63 = arith.constant 1 : index
    %c0_64 = arith.constant 0 : index
    %c0_65 = arith.constant 0 : index
    %117 = vector.load %arg9[%c1_63, %c0_64, %c0_65] : memref<3x8x64xf32, #tpu.memory_space<vmem>>, vector<1x8x64xf32>
    %118 = vector.shape_cast %117 : vector<1x8x64xf32> to vector<8x64xf32>
    %119 = vector.shape_cast %116 : vector<8x64xf32> to vector<1x8x64xf32>
    tpu.vector_store %arg9[%c1_63, %c0_64, %c0_65], %119 {strides = array<i32>} : memref<3x8x64xf32, #tpu.memory_space<vmem>>, vector<1x8x64xf32>,
    %c1_66 = arith.constant 1 : index
    %c0_67 = arith.constant 0 : index
    %c0_68 = arith.constant 0 : index
    %120 = vector.load %arg10[%c1_66, %c0_67, %c0_68] : memref<3x8x64xf32, #tpu.memory_space<vmem>>, vector<1x8x64xf32>
    %121 = vector.shape_cast %120 : vector<1x8x64xf32> to vector<8x64xf32>
    %122 = vector.shape_cast %114 : vector<8x64xf32> to vector<1x8x64xf32>
    tpu.vector_store %arg10[%c1_66, %c0_67, %c0_68], %122 {strides = array<i32>} : memref<3x8x64xf32, #tpu.memory_space<vmem>>, vector<1x8x64xf32>,
    %123 = arith.truncf %116 : vector<8x64xf32> to vector<8x64xbf16>
    %c2_69 = arith.constant 2 : index
    %c0_70 = arith.constant 0 : index
    %c0_71 = arith.constant 0 : index
    %124 = vector.load %arg1[%c2_69, %c0_70, %c0_71] : memref<3x8x64xf32, #tpu.memory_space<vmem>>, vector<1x8x64xf32>
    %125 = vector.shape_cast %124 : vector<1x8x64xf32> to vector<8x64xf32>
    %c2_72 = arith.constant 2 : index
    %c0_73 = arith.constant 0 : index
    %c0_74 = arith.constant 0 : index
    %126 = vector.load %arg2[%c2_72, %c0_73, %c0_74] : memref<3x8x64xf32, #tpu.memory_space<vmem>>, vector<1x8x64xf32>
    %127 = vector.shape_cast %126 : vector<1x8x64xf32> to vector<8x64xf32>
    %128 = arith.truncf %125 : vector<8x64xf32> to vector<8x64xbf16>
    %129 = tpu.concatenate %123, %128 in 1 : vector<8x64xbf16>, vector<8x64xbf16> -> vector<8x128xbf16>
    %c2_75 = arith.constant 2 : index
    %c0_76 = arith.constant 0 : index
    %c0_77 = arith.constant 0 : index
    %130 = vector.load %arg4[%c2_75, %c0_76, %c0_77] : memref<3x128x256xbf16, #tpu.memory_space<vmem>>, vector<1x128x256xbf16>
    %131 = vector.shape_cast %130 : vector<1x128x256xbf16> to vector<128x256xbf16>
    %cst_78 = arith.constant dense<0.000000e+00> : vector<8x256xf32>
    %132 = tpu.matmul %129, %131, %cst_78 {dimension_numbers = #tpu.dot_dimension_numbers<[1], [0], [0], [1], [0, 0, 1, 1], [], []>} : vector<8x128xbf16>, vector<128x256xbf16>, vector<8x256xf32> -> vector<8x256xf32>
    %c2_79 = arith.constant 2 : index
    %c0_80 = arith.constant 0 : index
    %c0_81 = arith.constant 0 : index
    %133 = vector.load %arg5[%c2_79, %c0_80, %c0_81] : memref<3x1x256xf32, #tpu.memory_space<vmem>>, vector<1x1x256xf32>
    %134 = vector.shape_cast %133 : vector<1x1x256xf32> to vector<1x256xf32>
    %135 = vector.broadcast %134 : vector<1x256xf32> to vector<8x256xf32>
    %136 = arith.addf %132, %135 : vector<8x256xf32>
    %137 = vector.extract_strided_slice %136 {offsets = [0, 0], sizes = [8, 64], strides = [1, 1]} : vector<8x256xf32> to vector<8x64xf32>
    %138 = arith.negf %137 : vector<8x64xf32>
    %139 = math.exp %138 : vector<8x64xf32>
    %cst_82 = arith.constant 1.000000e+00 : f32
    %140 = vector.broadcast %cst_82 : f32 to vector<8x64xf32>
    %141 = arith.addf %140, %139 : vector<8x64xf32>
    %142 = arith.divf %140, %141 : vector<8x64xf32>
    %143 = vector.extract_strided_slice %136 {offsets = [0, 64], sizes = [8, 64], strides = [1, 1]} : vector<8x256xf32> to vector<8x64xf32>
    %144 = arith.negf %143 : vector<8x64xf32>
    %145 = math.exp %144 : vector<8x64xf32>
    %cst_83 = arith.constant 1.000000e+00 : f32
    %146 = vector.broadcast %cst_83 : f32 to vector<8x64xf32>
    %147 = arith.addf %146, %145 : vector<8x64xf32>
    %148 = arith.divf %146, %147 : vector<8x64xf32>
    %149 = vector.extract_strided_slice %136 {offsets = [0, 128], sizes = [8, 64], strides = [1, 1]} : vector<8x256xf32> to vector<8x64xf32>
    %150 = math.tanh %149 : vector<8x64xf32>
    %151 = vector.extract_strided_slice %136 {offsets = [0, 192], sizes = [8, 64], strides = [1, 1]} : vector<8x256xf32> to vector<8x64xf32>
    %152 = arith.negf %151 : vector<8x64xf32>
    %153 = math.exp %152 : vector<8x64xf32>
    %cst_84 = arith.constant 1.000000e+00 : f32
    %154 = vector.broadcast %cst_84 : f32 to vector<8x64xf32>
    %155 = arith.addf %154, %153 : vector<8x64xf32>
    %156 = arith.divf %154, %155 : vector<8x64xf32>
    %157 = arith.mulf %148, %127 : vector<8x64xf32>
    %158 = arith.mulf %142, %150 : vector<8x64xf32>
    %159 = arith.addf %157, %158 : vector<8x64xf32>
    %160 = math.tanh %159 : vector<8x64xf32>
    %161 = arith.mulf %156, %160 : vector<8x64xf32>
    %c2_85 = arith.constant 2 : index
    %c0_86 = arith.constant 0 : index
    %c0_87 = arith.constant 0 : index
    %162 = vector.load %arg9[%c2_85, %c0_86, %c0_87] : memref<3x8x64xf32, #tpu.memory_space<vmem>>, vector<1x8x64xf32>
    %163 = vector.shape_cast %162 : vector<1x8x64xf32> to vector<8x64xf32>
    %164 = vector.shape_cast %161 : vector<8x64xf32> to vector<1x8x64xf32>
    tpu.vector_store %arg9[%c2_85, %c0_86, %c0_87], %164 {strides = array<i32>} : memref<3x8x64xf32, #tpu.memory_space<vmem>>, vector<1x8x64xf32>,
    %c2_88 = arith.constant 2 : index
    %c0_89 = arith.constant 0 : index
    %c0_90 = arith.constant 0 : index
    %165 = vector.load %arg10[%c2_88, %c0_89, %c0_90] : memref<3x8x64xf32, #tpu.memory_space<vmem>>, vector<1x8x64xf32>
    %166 = vector.shape_cast %165 : vector<1x8x64xf32> to vector<8x64xf32>
    %167 = vector.shape_cast %159 : vector<8x64xf32> to vector<1x8x64xf32>
    tpu.vector_store %arg10[%c2_88, %c0_89, %c0_90], %167 {strides = array<i32>} : memref<3x8x64xf32, #tpu.memory_space<vmem>>, vector<1x8x64xf32>,
    %168 = arith.truncf %161 : vector<8x64xf32> to vector<8x64xbf16>
    %c0_91 = arith.constant 0 : index
    %c0_92 = arith.constant 0 : index
    %169 = vector.load %arg6[%c0_91, %c0_92] : memref<64x128xbf16, #tpu.memory_space<vmem>>, vector<64x128xbf16>
    %cst_93 = arith.constant dense<0.000000e+00> : vector<8x128xf32>
    %170 = tpu.matmul %168, %169, %cst_93 {dimension_numbers = #tpu.dot_dimension_numbers<[1], [0], [0], [1], [0, 0, 1, 1], [], []>} : vector<8x64xbf16>, vector<64x128xbf16>, vector<8x128xf32> -> vector<8x128xf32>
    %c0_94 = arith.constant 0 : index
    %c0_95 = arith.constant 0 : index
    %171 = vector.load %arg7[%c0_94, %c0_95] : memref<1x128xf32, #tpu.memory_space<vmem>>, vector<1x128xf32>
    %172 = vector.broadcast %171 : vector<1x128xf32> to vector<8x128xf32>
    %173 = arith.addf %170, %172 : vector<8x128xf32>
    %c0_96 = arith.constant 0 : index
    %c0_97 = arith.constant 0 : index
    %174 = vector.load %arg8[%c0_96, %c0_97] : memref<8x128xf32, #tpu.memory_space<vmem>>, vector<8x128xf32>
    tpu.vector_store %arg8[%c0_96, %c0_97], %173 {strides = array<i32>} : memref<8x128xf32, #tpu.memory_space<vmem>>, vector<8x128xf32>,
    return
  }
}

</mosaic_0001>

<bundles_post_ra>
// kernel: generative_model_forward.1
= control target key start
LH: loop header
LB: loop body
LE: loop exit
PB: predicated region body
PF: predicated region fallthrough
CT: control target
= control target key end

     0   :  { %16 = vsyncpa [#allocation6], 0  ;;  %s1380_s0 = inlined_call_operand.vmem [shape: s32[8], index: 0, kind: input, shape index: {}]   ;;  %s1381_s1 = inlined_call_operand.vmem [shape: f32[3,8,64], index: 1, kind: input, shape index: {}, may-alias: {1,9}]   ;;  %s1382_s2 = inlined_call_operand.vmem [shape: f32[3,8,64], index: 2, kind: input, shape index: {}, may-alias: {2,10}]   ;;  %s1383_s3 = inlined_call_operand.vmem [shape: f32[50,64], index: 3, kind: input, shape index: {}]   ;;  %s1384_s4 = inlined_call_operand.hbm [shape: bf16[3,128,256], index: 4, kind: input, shape index: {}]   ;;  %s1385_s5 = inlined_call_operand.vmem [shape: f32[3,1,256], index: 5, kind: input, shape index: {}]   ;;  %s1386_s6 = inlined_call_operand.hbm [shape: bf16[64,128], index: 6, kind: input, shape index: {}]   ;;  %s1387_s7 = inlined_call_operand.vmem [shape: f32[1,128], index: 7, kind: input, shape index: {}]   ;;  %s1388_s8 = inlined_call_operand.hbm [shape: f32[8,128], index: 8, kind: output, shape index: {0}]   ;;  %s1389_s9 = inlined_call_operand.vmem [shape: f32[3,8,64], index: 9, kind: output, shape index: {1}, may-alias: {1,9}]   ;;  %s1390_s10 = inlined_call_operand.vmem [shape: f32[3,8,64], index: 10, kind: output, shape index: {2}, may-alias: {2,10}]  }
   0x1   :  { %17 = vsyncpa [#allocation4], 0 }
   0x2   :  { %18 = vsyncpa [#allocation9], 0 }
   0x3   :  { %19 = vsyncpa [#allocation5], 0  ;;  %s26_s15 = sshll.u32 %s1380_s0, 4  ;;  %s27_s15 = int_to_ptr.vmem [resolvable:$true] %s26_s15 }
   0x4   :  { %s1053_s16 = scalar_lea.vmem %s27_s15, 16  ;;  %p1058_p1 = scmp.lt.s32.totalorder %s27_s15, %s27_s15 }
   0x5   :  { %p1054_p0 = scmp.ne.s32.totalorder %s27_s15, %s1053_s16  ;;  %p1059_p2 = scmp.lt.s32.totalorder %s1053_s16, %s1053_s16 }
   0x7   :  { %p1060_p3 = por %p1059_p2, %p1058_p1 }
   0x9   :  { %p1061_p4 = pnand %p1060_p3, %p1054_p0 }
   0xb   :  { %1064 = shalt.err (!%p1061_p4)
}
   0xc   :  { %s1139_s17 = smov [#allocation3]   ;;  %s1140_s18 = smov [#allocation7]  }
   0xd   :  { %29 = dma.vmem_to_smem %s27_s15, 16, %s1139_s17, [#allocation6]  }
   0xe   :  { %s41_s19 = sshll.u32 %s1140_s18, 4  ;;  %s1065_s22 = scalar_lea.hbm %s1384_s4, 6144  ;;  %s42_s19 = int_to_ptr.vmem [resolvable:$true] %s41_s19 }
   0xf   :  { %p1066_p5 = scmp.ne.s32.totalorder %s1384_s4, %s1065_s22  ;;  %p1069_p6 = scmp.lt.u32.totalorder %s1065_s22, %s1384_s4 }
  0x11   :  { %p1071_p7 = pnand %p1069_p6, %p1066_p5 }
  0x13   :  { %1074 = shalt.err (!%p1071_p7)
}
  0x14   :  { %s1075_s26 = scalar_lea.vmem %s42_s19, 6144  ;;  %p1080_p9 = scmp.lt.s32.totalorder %s42_s19, %s42_s19 }
  0x15   :  { %p1076_p8 = scmp.ne.s32.totalorder %s42_s19, %s1075_s26  ;;  %p1081_p10 = scmp.lt.s32.totalorder %s1075_s26, %s1075_s26 }
  0x17   :  { %p1082_p11 = por %p1081_p10, %p1080_p9 }
  0x19   :  { %p1083_p12 = pnand %p1082_p11, %p1076_p8 }
  0x1b   :  { %1086 = shalt.err (!%p1083_p12)
}
  0x1c   :  { %s1141_s27 = smov 128   ;;  %s1142_s28 = smov 8  }
  0x1d   :  { %47 = dma.hbm_to_vmem [thread:$0]  %s1384_s4, 6144, %s42_s19, [#allocation4], %s1141_s27, %s1141_s27, %s1142_s28  }
  0x1e   :  { %s1143_s11 = smov [#allocation8]   ;;  %s1087_s15 = scalar_lea.hbm %s1386_s6, 512 }
  0x1f   :  { %s55_s12 = sshll.u32 %s1143_s11, 4  ;;  %p1088_p13 = scmp.ne.s32.totalorder %s1386_s6, %s1087_s15  ;;  %s56_s12 = int_to_ptr.vmem [resolvable:$true] %s55_s12 }
  0x20   :  { %p1091_p0 = scmp.lt.u32.totalorder %s1087_s15, %s1386_s6 }
  0x22   :  { %p1093_p1 = pnand %p1091_p0, %p1088_p13 }
  0x24   :  { %1096 = shalt.err (!%p1093_p1)
}
  0x25   :  { %s1097_s21 = scalar_lea.vmem %s56_s12, 512  ;;  %p1102_p3 = scmp.lt.s32.totalorder %s56_s12, %s56_s12 }
  0x26   :  { %p1098_p2 = scmp.ne.s32.totalorder %s56_s12, %s1097_s21  ;;  %p1103_p4 = scmp.lt.s32.totalorder %s1097_s21, %s1097_s21 }
  0x28   :  { %p1104_p5 = por %p1103_p4, %p1102_p3 }
  0x2a   :  { %p1105_p6 = pnand %p1104_p5, %p1098_p2 }
  0x2c   :  { %1108 = shalt.err (!%p1105_p6)
}
  0x2d   :  { %s1144_s4 = smov 64   ;;  %s1145_s19 = smov 4  }
  0x2e   :  { %61 = dma.hbm_to_vmem [thread:$0]  %s1386_s6, 512, %s56_s12, [#allocation9], %s1144_s4, %s1144_s4, %s1145_s19  }
  0x2f   :  { %1131 = dma.done.wait [#allocation6], 16  }
  0x30   :  { %1132 = vsyncadd [#allocation6], 4294967280 }
  0x31   :  { %1133 = dma.done.wait [#allocation4], 6144  }
  0x32   :  { %1134 = vsyncadd [#allocation4], 4294961152 }
  0x33   :  { %1135 = dma.done.wait [#allocation9], 512  }
  0x34   :  { %1136 = vsyncadd [#allocation9], 4294966784 }
  0x35   :  { %73 = sfence }
  0x36   :  { %v110_v0 = vld [vmem:[%s1381_s1] sm:$0xff]  ;;  %s75_s25 = sld [smem:[#allocation3]]  ;;  %v941_v2 = vld [vmem:[#allocation7 + $0x4] ss:$8 sps:$4 sm:$0xff]   ;;  %v943_v3 = vld [vmem:[#allocation7] ss:$8 sps:$4 sm:$0xff]   ;;  %v139_v32 = vlaneseq }
  0x37   :  { %v112_v1 = vpack.c.bf16 %v110_v0, %v110_v0  ;;  %v1146_v4 = vmov 0   ;;  %v944_v5 = vld [vmem:[#allocation7 + $0x14] ss:$8 sps:$4 sm:$0xff]   ;;  %229 = vmatprep.subr.bf16.mxu0 %v941_v2  ;;  %s836_s6 = sld [smem:[#allocation3 + $0x1]]  ;;  %v946_v6 = vld [vmem:[#allocation7 + $0x10] ss:$8 sps:$4 sm:$0xff]  }
  0x38   :  { %261 = vmatprep.mubr.bf16.mxu0 %v1146_v4  ;;  %464 = vmatprep.mubr.bf16.mxu1 %v1146_v4  ;;  %s837_s26 = sld [smem:[#allocation3 + $0x2]]  ;;  %v947_v7 = vld [vmem:[#allocation7 + $0x24] ss:$8 sps:$4 sm:$0xff]   ;;  %s838_s27 = sld [smem:[#allocation3 + $0x3]]  ;;  %v949_v8 = vld [vmem:[#allocation7 + $0x20] ss:$8 sps:$4 sm:$0xff]  }
  0x39   :  { %114 = vrot.lane.b32.xlu0 %v112_v1, %s1144_s4  ;;  %230 = vmatpush1.bf16.msra.mxu0 %v943_v3  ;;  %s839_s11 = sld [smem:[#allocation3 + $0x4]]  ;;  %v950_v9 = vld [vmem:[#allocation7 + $0x34] ss:$8 sps:$4 sm:$0xff]   ;;  %vm78_vm0 = vcmask 516096   ;;  %v952_v10 = vld [vmem:[#allocation7 + $0x30] ss:$8 sps:$4 sm:$0xff]  }
  0x3a   :  { %231 = vmatprep.subr.bf16.mxu0 %v944_v5  ;;  %s840_s18 = sld [smem:[#allocation3 + $0x5]]  ;;  %s841_s20 = sld [smem:[#allocation3 + $0x6]]  ;;  %v111_v14 = vld [vmem:[%s1382_s2] sm:$0xff]  ;;  %v953_v15 = vld [vmem:[#allocation7 + $0x44] ss:$8 sps:$4 sm:$0xff]   ;;  %vm116_vm1 = vcmask 523264  }
  0x3b   :  { %s842_s0 = sld [smem:[#allocation3 + $0x7]]  ;;  %v955_v16 = vld [vmem:[#allocation7 + $0x40] ss:$8 sps:$4 sm:$0xff]   ;;  %v956_v18 = vld [vmem:[#allocation7 + $0x54] ss:$8 sps:$4 sm:$0xff]   ;;  %v140_v33 = vshrl.u32 %v139_v32, 7 }
  0x3c   :  { %s76_s30 = scalar_lea.vmem %s1383_s3, %s75_s25  ;;  %v958_v20 = vld [vmem:[#allocation7 + $0x50] ss:$8 sps:$4 sm:$0xff]   ;;  %v959_v21 = vld [vmem:[#allocation7 + $0x64] ss:$8 sps:$4 sm:$0xff]   ;;  %v961_v25 = vld [vmem:[#allocation7 + $0x60] ss:$8 sps:$4 sm:$0xff]  }
  0x3d   :  { %232 = vmatpush1.bf16.msra.mxu0 %v946_v6  ;;  %s81_s14 = scalar_lea.vmem %s1383_s3, %s836_s6  ;;  %v77_v11 = vld [vmem:[%s76_s30] sm:$0x1]  ;;  %284 = vrot.lane.b32.xlu0 %v111_v14, %s1144_s4  ;;  %v962_v26 = vld [vmem:[#allocation7 + $0x74] ss:$8 sps:$4 sm:$0xff]   ;;  %v1278_v34 = vsub.s32 0, %v140_v33  ;;  %v1284_v43 = vsub.s32 1, %v140_v33 }
  0x3e   :  { %233 = vmatprep.subr.bf16.mxu0 %v947_v7  ;;  %s85_s17 = scalar_lea.vmem %s1383_s3, %s837_s26  ;;  %v82_v12 = vld [vmem:[%s81_s14] sm:$0x1]  ;;  %79 = vst.msk [vmem:[#allocation2] sm:$0x1] %vm78_vm0, %v77_v11  ;;  %s89_s24 = scalar_lea.vmem %s1383_s3, %s838_s27  ;;  %v861_v48 = vld [vmem:[%s1381_s1 + $0x8] sm:$0xff]  ;;  %vm1148_vm2 = vmmov 0  }
  0x3f   :  { %v86_v13 = vld [vmem:[%s85_s17] sm:$0x1]  ;;  %83 = vst.msk [vmem:[#allocation2 + $0x1] sm:$0x1] %vm78_vm0, %v82_v12  ;;  %s93_s26 = scalar_lea.vmem %s1383_s3, %s839_s11  ;;  %v311_v49 = vpack.c.bf16 %v861_v48, %v861_v48  ;;  %v965_v53 = vld [vmem:[#allocation7 + $0x84] ss:$8 sps:$4 sm:$0xff]  }
  0x40   :  { %87 = vst.msk [vmem:[#allocation2 + $0x2] sm:$0x1] %vm78_vm0, %v86_v13  ;;  %v90_v17 = vld [vmem:[%s89_s24] sm:$0x1]  ;;  %s97_s29 = scalar_lea.vmem %s1383_s3, %s840_s18  ;;  %s101_s13 = scalar_lea.vmem %s1383_s3, %s841_s20  ;;  %v967_v54 = vld [vmem:[#allocation7 + $0x80] ss:$8 sps:$4 sm:$0xff]   ;;  %432 = vmatprep.subr.bf16.mxu1 %v965_v53 }
  0x41   :  { %234 = vmatpush1.bf16.msra.mxu0 %v949_v8  ;;  %91 = vst.msk [vmem:[#allocation2 + $0x3] sm:$0x1] %vm78_vm0, %v90_v17  ;;  %v94_v19 = vld [vmem:[%s93_s26] sm:$0x1]  ;;  %s105_s15 = scalar_lea.vmem %s1383_s3, %s842_s0  ;;  %316 = vrot.lane.b32.xlu0 %v311_v49, %s1144_s4  ;;  %v968_v55 = vld [vmem:[#allocation7 + $0x94] ss:$8 sps:$4 sm:$0xff]  }
  0x42   :  { %235 = vmatprep.subr.bf16.mxu0 %v950_v9  ;;  %95 = vst.msk [vmem:[#allocation2 + $0x4] sm:$0x1] %vm78_vm0, %v94_v19  ;;  %v98_v22 = vld [vmem:[%s97_s29] sm:$0x1]  ;;  %433 = vmatpush1.bf16.msra.mxu1 %v967_v54  ;;  %v971_v57 = vld [vmem:[#allocation7 + $0xa4] ss:$8 sps:$4 sm:$0xff]  }
  0x43   :  { %v102_v23 = vld [vmem:[%s101_s13] sm:$0x1]  ;;  %99 = vst.msk [vmem:[#allocation2 + $0x5] sm:$0x1] %vm78_vm0, %v98_v22  ;;  %434 = vmatprep.subr.bf16.mxu1 %v968_v55  ;;  %v973_v58 = vld [vmem:[#allocation7 + $0xa0] ss:$8 sps:$4 sm:$0xff]  }
  0x44   :  { %103 = vst.msk [vmem:[#allocation2 + $0x6] sm:$0x1] %vm78_vm0, %v102_v23  ;;  %v106_v24 = vld [vmem:[%s105_s15] sm:$0x1]  ;;  %v974_v59 = vld [vmem:[#allocation7 + $0xb4] ss:$8 sps:$4 sm:$0xff]  }
  0x45   :  { %236 = vmatpush1.bf16.msra.mxu0 %v952_v10  ;;  %107 = vst.msk [vmem:[#allocation2 + $0x7] sm:$0x1] %vm78_vm0, %v106_v24  ;;  %v964_v27 = vld [vmem:[#allocation7 + $0x70] ss:$8 sps:$4 sm:$0xff]   ;;  %v977_v61 = vld [vmem:[#allocation7 + $0xc4] ss:$8 sps:$4 sm:$0xff]  }
  0x46   :  { %237 = vmatprep.subr.bf16.mxu0 %v953_v15  ;;  %v137_v35 = vld [vmem:[%s1385_s5] sm:$0x3]  ;;  %v979_v62 = vld [vmem:[#allocation7 + $0xc0] ss:$8 sps:$4 sm:$0xff]   ;;  %v980_v63 = vld [vmem:[#allocation7 + $0xd4] ss:$8 sps:$4 sm:$0xff]  }
  0x47   :  { %v142_v36 = vrot.slane %v137_v35, %v1278_v34  ;;  %v146_v44 = vrot.slane %v137_v35, %v1284_v43  ;;  %v970_v56 = vld [vmem:[#allocation7 + $0x90] ss:$8 sps:$4 sm:$0xff]   ;;  %v983_v1 = vld [vmem:[#allocation7 + $0xe4] ss:$8 sps:$4 sm:$0xff]   ;;  %v985_v2 = vld [vmem:[#allocation7 + $0xe0] ss:$8 sps:$4 sm:$0xff]  }
  0x48   :  { %435 = vmatpush1.bf16.msra.mxu1 %v970_v56  ;;  %v976_v60 = vld [vmem:[#allocation7 + $0xb0] ss:$8 sps:$4 sm:$0xff]   ;;  %v986_v3 = vld [vmem:[#allocation7 + $0xf4] ss:$8 sps:$4 sm:$0xff]   ;;  %v884_v35 = vld [vmem:[%s1381_s1 + $0x10] sm:$0xff]  ;;  %s1149_s3 = smov [#allocation10]  }
  0x49   :  { %238 = vmatpush1.bf16.msra.mxu0 %v955_v16  ;;  %436 = vmatprep.subr.bf16.mxu1 %v971_v57  ;;  %v982_v0 = vld [vmem:[#allocation7 + $0xd0] ss:$8 sps:$4 sm:$0xff]   ;;  %v862_v16 = vld [vmem:[%s1382_s2 + $0x8] sm:$0xff]  ;;  %v1006_v49 = vld [vmem:[#allocation7 + $0x154] ss:$8 sps:$4 sm:$0xff]   ;;  %s809_s16 = sshll.u32 %s1149_s3, 4  ;;  %s810_s16 = int_to_ptr.vmem [resolvable:$true] %s809_s16 }
  0x4a   :  { %239 = vmatprep.subr.bf16.mxu0 %v956_v18  ;;  %v1001_v48 = vld [vmem:[#allocation7 + $0x140] ss:$8 sps:$4 sm:$0xff]   ;;  %v1012_v53 = vld [vmem:[#allocation7 + $0x174] ss:$8 sps:$4 sm:$0xff]   ;;  %v1010_v54 = vld [vmem:[#allocation7 + $0x170] ss:$8 sps:$4 sm:$0xff]   ;;  %p1114_p8 = scmp.lt.s32.totalorder %s810_s16, %s810_s16 }
  0x4b   :  { %s1109_s17 = scalar_lea.vmem %s810_s16, 128 }
  0x4c   :  { %v108_v28 = vld [vmem:[#allocation2] sm:$0xff]  ;;  %437 = vmatpush1.bf16.msra.mxu1 %v973_v58  ;;  %p1110_p7 = scmp.ne.s32.totalorder %s810_s16, %s1109_s17  ;;  %p1115_p9 = scmp.lt.s32.totalorder %s1109_s17, %s1109_s17 }
  0x4d   :  { %240 = vmatpush1.bf16.msra.mxu0 %v958_v20  ;;  %v109_v29 = vpack.c.bf16 %v108_v28, %v108_v28  ;;  %438 = vmatprep.subr.bf16.mxu1 %v974_v59  ;;  %v863_v20 = vld [vmem:[%s1385_s5 + $0x2] sm:$0x3] }
  0x4e   :  { %241 = vmatprep.subr.bf16.mxu0 %v959_v21  ;;  %v345_v21 = vrot.slane %v863_v20, %v1278_v34  ;;  %v349_v28 = vrot.slane %v863_v20, %v1284_v43  ;;  %p1116_p10 = por %p1115_p9, %p1114_p8 }
  0x50   :  { %439 = vmatpush1.bf16.msra.mxu1 %v976_v60  ;;  %p1117_p11 = pnand %p1116_p10, %p1110_p7 }
  0x51   :  { %242 = vmatpush1.bf16.msra.mxu0 %v961_v25  ;;  %440 = vmatprep.subr.bf16.mxu1 %v977_v61 }
  0x52   :  { %243 = vmatprep.subr.bf16.mxu0 %v962_v26 }
  0x54   :  { %441 = vmatpush1.bf16.msra.mxu1 %v979_v62 }
  0x55   :  { %244 = vmatpush1.bf16.msra.mxu0 %v964_v27  ;;  %442 = vmatprep.subr.bf16.mxu1 %v980_v63 }
  0x58   :  { %443 = vmatpush1.bf16.msra.mxu1 %v982_v0 }
  0x59   :  { %444 = vmatprep.subr.bf16.mxu1 %v983_v1 }
  0x5c   :  { %445 = vmatpush1.bf16.msra.mxu1 %v985_v2  ;;  %v885_v2 = vld [vmem:[%s1382_s2 + $0x10] sm:$0xff] }
  0x5d   :  { %446 = vmatprep.subr.bf16.mxu1 %v986_v3 }
  0xab   :  { %v115_v30 = vpop.permute.xlu0 %114 }
  0xac   :  { %v119_v31 = vsel %vm116_vm1, %v109_v29, %v115_v30 }
  0xad   :  { %262 = vmatmul.mubr.bf16.vlgmr.msra.gmra.mrb[0].mxu0 %v119_v31 }
  0xae   :  { %669 = vmatprep.mubr.bf16.mxu0 %v1146_v4  ;;  %v988_v4 = vld [vmem:[#allocation7 + $0xf0] ss:$8 sps:$4 sm:$0xff]  }
  0xaf   :  { %447 = vmatpush1.bf16.msra.mxu1 %v988_v4  ;;  %v285_v7 = vpop.permute.xlu0 %284 }
  0xb3   :  { %v317_v17 = vpop.permute.xlu0 %316 }
 0x180   :  { %v263_v37 = vpop.f32.mrb[0].mxu0 }
 0x181   :  { %v264_v38 = vadd.f32 %v263_v37, %v142_v36  ;;  %v265_v39 = vpop.f32.mrb[1].mxu0  ;;  %v516_v37 = vpack.c.bf16 %v884_v35, %v884_v35 }
 0x182   :  { %v267_v40 = vpop.f32.mrb[2].mxu0  ;;  %v266_v45 = vadd.f32 %v265_v39, %v146_v44  ;;  %v991_v39 = vld [vmem:[#allocation7 + $0x104] ss:$8 sps:$4 sm:$0xff]   ;;  %v995_v44 = vld [vmem:[#allocation7 + $0x120] ss:$8 sps:$4 sm:$0xff]  }
 0x183   :  { %v859_v41 = vmul.f32 -1.442695, %v264_v38  ;;  %v268_v42 = vpop.f32.mrb[3].mxu0  ;;  %v989_v38 = vld [vmem:[#allocation7 + $0x100] ss:$8 sps:$4 sm:$0xff]   ;;  %637 = vmatprep.subr.bf16.mxu0 %v991_v39 }
 0x184   :  { %v860_v5 = vmul.f32 -1.442695, %v266_v45  ;;  %v994_v40 = vld [vmem:[#allocation7 + $0x114] ss:$8 sps:$4 sm:$0xff]   ;;  %638 = vmatpush1.bf16.msra.mxu0 %v989_v38  ;;  %v997_v42 = vld [vmem:[#allocation7 + $0x124] ss:$8 sps:$4 sm:$0xff]  }
 0x185   :  { %1017 = vpow2.f32 %v859_v41  ;;  %v992_v41 = vld [vmem:[#allocation7 + $0x110] ss:$8 sps:$4 sm:$0xff]   ;;  %639 = vmatprep.subr.bf16.mxu0 %v994_v40 }
 0x186   :  { %1019 = vtanh.f32 %v266_v45  ;;  %v1000_v45 = vld [vmem:[#allocation7 + $0x134] ss:$8 sps:$4 sm:$0xff]  }
 0x188   :  { %640 = vmatpush1.bf16.msra.mxu0 %v992_v41 }
 0x189   :  { %641 = vmatprep.subr.bf16.mxu0 %v997_v42 }
 0x18c   :  { %642 = vmatpush1.bf16.msra.mxu0 %v995_v44  ;;  %v907_v44 = vld [vmem:[%s1387_s7] ss:$0 sm:$0xff] }
 0x18d   :  { %643 = vmatprep.subr.bf16.mxu0 %v1000_v45 }
 0x18f   :  { %v1018_v46 = vpop.eup %1017 }
 0x190   :  { %v273_v47 = vadd.f32 1.0, %v1018_v46  ;;  %v1020_v50 = vpop.eup %1019  ;;  %v998_v46 = vld [vmem:[#allocation7 + $0x130] ss:$8 sps:$4 sm:$0xff]  }
 0x191   :  { %644 = vmatpush1.bf16.msra.mxu0 %v998_v46 }
 0x192   :  { %1021 = vrcp.f32 %v273_v47  ;;  %v1003_v47 = vld [vmem:[#allocation7 + $0x144] ss:$8 sps:$4 sm:$0xff]  }
 0x193   :  { %1023 = vpow2.f32 %v860_v5  ;;  %645 = vmatprep.subr.bf16.mxu0 %v1003_v47 }
 0x195   :  { %646 = vmatpush1.bf16.msra.mxu0 %v1001_v48 }
 0x196   :  { %647 = vmatprep.subr.bf16.mxu0 %v1006_v49 }
 0x19c   :  { %v1022_v51 = vpop.eup %1021 }
 0x19d   :  { %v288_v52 = vmul.f32 %v1022_v51, %v1020_v50  ;;  %v1024_v6 = vpop.eup %1023  ;;  %v287_v9 = vmul.f32 %v1022_v51, %v285_v7  ;;  %v1004_v50 = vld [vmem:[#allocation7 + $0x150] ss:$8 sps:$4 sm:$0xff]   ;;  %v1009_v51 = vld [vmem:[#allocation7 + $0x164] ss:$8 sps:$4 sm:$0xff]  }
 0x19e   :  { %v280_v8 = vadd.f32 1.0, %v1024_v6  ;;  %648 = vmatpush1.bf16.msra.mxu0 %v1004_v50  ;;  %v886_v6 = vld [vmem:[%s1385_s5 + $0x4] sm:$0x3] }
 0x19f   :  { %290 = vrot.lane.b32.xlu1 %v288_v52, %s1144_s4  ;;  %v1007_v52 = vld [vmem:[#allocation7 + $0x160] ss:$8 sps:$4 sm:$0xff]   ;;  %649 = vmatprep.subr.bf16.mxu0 %v1009_v51  ;;  %v550_v7 = vrot.slane %v886_v6, %v1278_v34 }
 0x1a0   :  { %1025 = vrcp.f32 %v280_v8  ;;  %v1013_v34 = vld [vmem:[#allocation8] sm:$0xff]  }
 0x1a2   :  { %650 = vmatpush1.bf16.msra.mxu0 %v1007_v52 }
 0x1a3   :  { %651 = vmatprep.subr.bf16.mxu0 %v1012_v53 }
 0x1a6   :  { %652 = vmatpush1.bf16.msra.mxu0 %v1010_v54 }
 0x1aa   :  { %v1026_v12 = vpop.eup %1025 }
 0x211   :  { %v291_v10 = vpop.permute.xlu1 %290 }
 0x212   :  { %v1292_v11 = vadd.f32 %v291_v10, %v287_v9 }
 0x214   :  { %1027 = vtanh.f32 %v1292_v11 }
 0x21e   :  { %v1028_v13 = vpop.eup %1027 }
 0x21f   :  { %v1295_v14 = vmul.f32 %v1028_v13, %v1026_v12 }
 0x221   :  { %v306_v15 = vpack.c.bf16 %v1295_v14, %v1295_v14 }
 0x223   :  { %313 = vrot.lane.b32.xlu1 %v306_v15, %s1144_s4 }
 0x227   :  { %487 = vrot.lane.b32.xlu1 %v862_v16, %s1144_s4  ;;  %v554_v16 = vrot.slane %v886_v6, %v1284_v43  ;;  %v1014_v43 = vld [vmem:[#allocation8 + $0x8] sm:$0xff]  }
 0x295   :  { %v314_v18 = vpop.permute.xlu1 %313 }
 0x296   :  { %v320_v19 = vsel %vm116_vm1, %v314_v18, %v317_v17 }
 0x297   :  { %465 = vmatmul.mubr.bf16.vlgmr.msra.gmra.mrb[0].mxu1 %v320_v19 }
 0x299   :  { %v488_v57 = vpop.permute.xlu1 %487 }
 0x36a   :  { %v466_v22 = vpop.f32.mrb[0].mxu1 }
 0x36b   :  { %v467_v23 = vadd.f32 %v466_v22, %v345_v21  ;;  %v468_v24 = vpop.f32.mrb[1].mxu1 }
 0x36c   :  { %v470_v25 = vpop.f32.mrb[2].mxu1  ;;  %v469_v29 = vadd.f32 %v468_v24, %v349_v28  ;;  %v1015_v24 = vld [vmem:[#allocation8 + $0x10] sm:$0xff]  }
 0x36d   :  { %v880_v26 = vmul.f32 -1.442695, %v467_v23  ;;  %v471_v27 = vpop.f32.mrb[3].mxu1  ;;  %v1147_v23 = vmov 0.0   ;;  %v1016_v25 = vld [vmem:[#allocation8 + $0x18] sm:$0xff]  }
 0x36e   :  { %v881_v55 = vmul.f32 -1.442695, %v469_v29  ;;  %918 = vmatprep.subr.bf16.mxu1 %v1147_v23  ;;  %926 = vmatprep.mubr.msk.bf16.mxu1 %vm1148_vm2, %v1147_v23 }
 0x36f   :  { %1029 = vpow2.f32 %v880_v26  ;;  %919 = vmatpush3.bf16.msra.mxu1 %v1013_v34 }
 0x370   :  { %1031 = vtanh.f32 %v469_v29  ;;  %920 = vmatprep.subr.bf16.mxu1 %v1147_v23 }
 0x373   :  { %921 = vmatpush3.bf16.msra.mxu1 %v1014_v43 }
 0x374   :  { %922 = vmatprep.subr.bf16.mxu1 %v1147_v23 }
 0x377   :  { %923 = vmatpush3.bf16.msra.mxu1 %v1015_v24 }
 0x378   :  { %924 = vmatprep.subr.bf16.mxu1 %v1147_v23 }
 0x379   :  { %v1030_v30 = vpop.eup %1029 }
 0x37a   :  { %v476_v31 = vadd.f32 1.0, %v1030_v30  ;;  %v1032_v32 = vpop.eup %1031 }
 0x37b   :  { %925 = vmatpush3.bf16.msra.mxu1 %v1016_v25 }
 0x37c   :  { %1033 = vrcp.f32 %v476_v31 }
 0x37d   :  { %1035 = vpow2.f32 %v881_v55 }
 0x386   :  { %v1034_v33 = vpop.eup %1033 }
 0x387   :  { %v491_v36 = vmul.f32 %v1034_v33, %v1032_v32  ;;  %v1036_v56 = vpop.eup %1035  ;;  %v490_v59 = vmul.f32 %v1034_v33, %v488_v57 }
 0x388   :  { %v483_v58 = vadd.f32 1.0, %v1036_v56 }
 0x389   :  { %493 = vrot.lane.b32.xlu0 %v491_v36, %s1144_s4 }
 0x38a   :  { %1037 = vrcp.f32 %v483_v58 }
 0x38d   :  { %521 = vrot.lane.b32.xlu0 %v516_v37, %s1144_s4 }
 0x394   :  { %v1038_v62 = vpop.eup %1037 }
 0x3fb   :  { %v494_v60 = vpop.permute.xlu0 %493 }
 0x3fc   :  { %v1315_v61 = vadd.f32 %v494_v60, %v490_v59 }
 0x3fe   :  { %1039 = vtanh.f32 %v1315_v61 }
 0x3ff   :  { %v522_v3 = vpop.permute.xlu0 %521 }
 0x408   :  { %v1040_v63 = vpop.eup %1039 }
 0x409   :  { %v498_v0 = vmul.f32 %v1040_v63, %v1038_v62 }
 0x40b   :  { %v511_v1 = vpack.c.bf16 %v498_v0, %v498_v0 }
 0x40d   :  { %518 = vrot.lane.b32.xlu1 %v511_v1, %s1144_s4 }
 0x411   :  { %692 = vrot.lane.b32.xlu1 %v885_v2, %s1144_s4 }
 0x47f   :  { %v519_v4 = vpop.permute.xlu1 %518 }
 0x480   :  { %v525_v5 = vsel %vm116_vm1, %v519_v4, %v522_v3 }
 0x481   :  { %670 = vmatmul.mubr.bf16.vlgmr.msra.gmra.mrb[4].mxu0 %v525_v5 }
 0x483   :  { %v693_v28 = vpop.permute.xlu1 %692 }
 0x554   :  { %v671_v8 = vpop.f32.mrb[4].mxu0 }
 0x555   :  { %v672_v9 = vadd.f32 %v671_v8, %v550_v7  ;;  %v673_v10 = vpop.f32.mrb[5].mxu0 }
 0x556   :  { %v675_v12 = vpop.f32.mrb[6].mxu0  ;;  %v674_v17 = vadd.f32 %v673_v10, %v554_v16 }
 0x557   :  { %v903_v13 = vmul.f32 -1.442695, %v672_v9  ;;  %v676_v15 = vpop.f32.mrb[7].mxu0 }
 0x558   :  { %v904_v26 = vmul.f32 -1.442695, %v674_v17 }
 0x559   :  { %1041 = vpow2.f32 %v903_v13 }
 0x55a   :  { %1043 = vtanh.f32 %v674_v17 }
 0x563   :  { %v1042_v18 = vpop.eup %1041 }
 0x564   :  { %v681_v19 = vadd.f32 1.0, %v1042_v18  ;;  %v1044_v20 = vpop.eup %1043 }
 0x566   :  { %1045 = vrcp.f32 %v681_v19 }
 0x567   :  { %1047 = vpow2.f32 %v904_v26 }
 0x570   :  { %v1046_v21 = vpop.eup %1045 }
 0x571   :  { %v696_v22 = vmul.f32 %v1046_v21, %v1044_v20  ;;  %v1048_v27 = vpop.eup %1047  ;;  %v695_v29 = vmul.f32 %v1046_v21, %v693_v28 }
 0x573   :  { %698 = vrot.lane.b32.xlu0 %v696_v22, %s1144_s4 }
 0x577   :  { %297 = vrot.lane.b32.xlu0 %v1295_v14, %s1144_s4  ;;  %v688_v14 = vadd.f32 1.0, %v1048_v27 }
 0x579   :  { %1049 = vrcp.f32 %v688_v14 }
 0x57b   :  { %500 = vrot.lane.b32.xlu0 %v498_v0, %s1144_s4 }
 0x583   :  { %v1050_v35 = vpop.eup %1049 }
 0x5e5   :  { %v699_v30 = vpop.permute.xlu0 %698 }
 0x5e6   :  { %v701_v31 = vadd.f32 %v699_v30, %v695_v29 }
 0x5e8   :  { %1051 = vtanh.f32 %v701_v31 }
 0x5e9   :  { %v298_v32 = vpop.permute.xlu0 %297 }
 0x5ea   :  { %300 = vst.msk [vmem:[%s1389_s9] sm:$0xff] %vm116_vm1, %v298_v32 }
 0x5ed   :  { %v501_v33 = vpop.permute.xlu0 %500 }
 0x5ee   :  { %882 = vst.msk [vmem:[%s1389_s9 + $0x8] sm:$0xff] %vm116_vm1, %v501_v33 }
 0x5f2   :  { %v1052_v36 = vpop.eup %1051 }
 0x5f3   :  { %v703_v37 = vmul.f32 %v1052_v36, %v1050_v35 }
 0x5f5   :  { %705 = vrot.lane.b32.xlu0 %v703_v37, %s1144_s4  ;;  %v716_v38 = vpack.c.bf16 %v703_v37, %v703_v37 }
 0x5f7   :  { %733 = vrot.lane.b32.xlu1 %v716_v38, %s1144_s4 }
 0x5fb   :  { %302 = vrot.lane.b32.xlu1 %v1292_v11, %s1144_s4 }
 0x5ff   :  { %506 = vrot.lane.b32.xlu1 %v1315_v61, %s1144_s4 }
 0x603   :  { %711 = vrot.lane.b32.xlu1 %v701_v31, %s1144_s4 }
 0x667   :  { %v706_v39 = vpop.permute.xlu0 %705 }
 0x668   :  { %905 = vst.msk [vmem:[%s1389_s9 + $0x10] sm:$0xff] %vm116_vm1, %v706_v39 }
 0x669   :  { %v734_v40 = vpop.permute.xlu1 %733 }
 0x66a   :  { %927 = vmatmul.mubr.msk.bf16.vlgmr.msra.gmra.mrb[4].mxu1 %vm116_vm1, %v734_v40 }
 0x66d   :  { %v303_v41 = vpop.permute.xlu1 %302 }
 0x66e   :  { %305 = vst.msk [vmem:[%s1390_s10] sm:$0xff] %vm116_vm1, %v303_v41 }
 0x671   :  { %v507_v11 = vpop.permute.xlu1 %506 }
 0x672   :  { %883 = vst.msk [vmem:[%s1390_s10 + $0x8] sm:$0xff] %vm116_vm1, %v507_v11 }
 0x675   :  { %v712_v42 = vpop.permute.xlu1 %711 }
 0x676   :  { %906 = vst.msk [vmem:[%s1390_s10 + $0x10] sm:$0xff] %vm116_vm1, %v712_v42 }
 0x73d   :  { %v796_v45 = vpop.f32.mrb[4].mxu1 }
 0x73e   :  { %v797_v46 = vadd.f32 %v907_v44, %v796_v45  ;;  %v928_v47 = vpop.f32.mrb[5].mxu1 }
 0x73f   :  { %v799_v48 = vpop.f32.mrb[6].mxu1 }
 0x740   :  { %802 = vst [vmem:[#allocation10] sm:$0xff] %v797_v46  ;;  %v929_v49 = vpop.f32.mrb[7].mxu1 }
 0x741   :  { %1120 = shalt.err (!%p1117_p11)
}
 0x742   :  { %s1121_s7 = scalar_lea.hbm %s1388_s8, 128 }
 0x743   :  { %p1122_p12 = scmp.ne.s32.totalorder %s1388_s8, %s1121_s7  ;;  %p1125_p13 = scmp.lt.u32.totalorder %s1121_s7, %s1388_s8 }
 0x745   :  { %p1127_p0 = pnand %p1125_p13, %p1122_p12 }
 0x747   :  { %1130 = shalt.err (!%p1127_p0)
}
 0x748   :  { %812 = dma.vmem_to_hbm [thread:$0]  %s810_s16, 128, %s1388_s8, [#allocation5]  }
 0x749   :  { %1137 = dma.done.wait [#allocation5], 128  }
 0x74a   :  { %1138 = vsyncadd [#allocation5], 4294967168 }
 0x74b   :  { %824 = vsyncpa [#allocation4], 1 }
 0x74c   :  { %825 = vsyncpa [#allocation9], 1 }
 0x74d   :  { %826 = vsyncpa [#allocation5], 1 }
 0x74e   :  { %827 = vsyncpa [#allocation6], 1 }

</bundles_post_ra>
